<compile_context>
chip_gen: v5e
topology: v5e:2x2
jax: 0.10.0
libtpu: 0.0.40
codegen_flags: <defaults>
</compile_context>

<pallas_src>
import functools
from typing import NamedTuple

import jax
import jax.numpy as jnp
from jax import lax
from jax.experimental import pallas as pl
from jax.experimental.pallas import tpu as pltpu

_LANE = 128


def _round_up(x, m):
    return ((x + m - 1) // m) * m


def _gelu_exact(x):
    # nn.GELU() default = exact erf-based GELU.
    return 0.5 * x * (1.0 + lax.erf(x * 0.7071067811865476))


def _act_fn(name):
    # Matches SliceLearner.ACTIVATION (all plain VPU/EUP elementwise ops).
    if name == "gelu":
        return _gelu_exact
    if name == "tanh":
        return jnp.tanh
    if name == "sigmoid":
        return jax.nn.sigmoid
    if name == "relu":
        return lambda v: jnp.maximum(v, 0.0)
    if name == "leaky_relu":
        return lambda v: jnp.where(v >= 0.0, v, 0.1 * v)
    if name == "softplus":
        return jax.nn.softplus
    if name == "ELU":
        return jax.nn.elu
    if name == "silu":
        return lambda v: v * jax.nn.sigmoid(v)
    raise NotImplementedError(name)


class MLPDims(NamedTuple):
    n_input: int
    n_hidden: int
    n_output: int
    n_in_p: int
    n_hid_p: int
    n_out_p: int


def _tpu_info():
    """(generation, per-core VMEM bytes, TensorCores/chip) with safe fallbacks."""
    gen = 0
    try:
        kind = jax.devices()[0].device_kind.lower()
    except Exception:
        kind = ""
    if "v7" in kind or "7x" in kind:
        gen = 7
    elif "v6" in kind:
        gen = 6
    elif "v5" in kind:
        gen = 5
    elif "v4" in kind:
        gen = 4
    vmem = None
    try:
        info = pltpu.get_tpu_info()
        vmem = getattr(info, "vmem_capacity_bytes", None)
        if vmem is not None:
            vmem = int(vmem)
    except Exception:
        vmem = None
    if vmem is None or vmem <= 0:
        vmem = 64 * 2**20 if gen in (0, 7) else 128 * 2**20
    num_tc = 2 if gen == 7 else 1
    return gen, vmem, num_tc


def prepare_mlp_params(params, *, n_layers, compute_dtype=jnp.bfloat16):
    """Pad / cast / pack the weight dict ONCE (do this outside the hot path).

    Returns (weight_args, dims):
      weight_args = (w_pre[(I_p,H_p) cdt], b_hid[(L+1,H_p) f32],
                     [w_hid[(L,H_p,H_p) cdt] if L>0], w_post[(H_p,O_p) cdt],
                     b_post[(1,O_p) f32])
    """
    w_pre = jnp.asarray(params["w_pre"], jnp.float32)
    n_input, n_hidden = w_pre.shape
    n_output = jnp.asarray(params["w_post"]).shape[1]
    n_in_p = _round_up(n_input, _LANE)
    n_hid_p = _round_up(n_hidden, _LANE)
    n_out_p = _round_up(n_output, _LANE)

    def pad_w(w, rows, cols):
        w = jnp.asarray(w, jnp.float32)
        w = jnp.pad(w, ((0, rows - w.shape[0]), (0, cols - w.shape[1])))
        return w.astype(compute_dtype)

    def pad_b(b, cols):
        b = jnp.asarray(b, jnp.float32).reshape(-1)
        return jnp.pad(b, (0, cols - b.shape[0]))

    args = [pad_w(params["w_pre"], n_in_p, n_hid_p)]
    b_rows = [pad_b(params["b_pre"], n_hid_p)]
    b_rows += [pad_b(params[f"b_{i}"], n_hid_p) for i in range(n_layers)]
    args.append(jnp.stack(b_rows, axis=0))                       # (L+1, H_p) f32
    if n_layers > 0:
        args.append(jnp.stack(
            [pad_w(params[f"w_{i}"], n_hid_p, n_hid_p) for i in range(n_layers)],
            axis=0))                                             # (L, H_p, H_p)
    args.append(pad_w(params["w_post"], n_hid_p, n_out_p))
    args.append(pad_b(params["b_post"], n_out_p).reshape(1, n_out_p))

    dims = MLPDims(n_input, n_hidden, n_output, n_in_p, n_hid_p, n_out_p)
    return tuple(args), dims


def _resident_spec(shape):
    """Full-array BlockSpec with a constant block index (weights stay in VMEM)."""
    ndim = len(shape)
    index_map = lambda i: (0,) * ndim
    try:
        # Single-buffered: block index never changes, one VMEM copy suffices.
        return pl.BlockSpec(shape, index_map, pipeline_mode=pl.Buffered(1))
    except (TypeError, AttributeError):
        return pl.BlockSpec(shape, index_map)


def _make_mlp_kernel(n_layers, res, act):
    act_fn = _act_fn(act)

    def kernel(x_ref, *refs):
        if n_layers > 0:
            w_pre, b_hid, w_hid, w_post, b_post, o_ref = refs
        else:
            w_pre, b_hid, w_post, b_post, o_ref = refs
            w_hid = None
        cdt = w_pre.dtype                       # MXU operand dtype
        b_all = b_hid[...]                      # (n_layers+1, H_p) f32

        x = x_ref[...].astype(cdt)              # cast to MXU dtype inside kernel
        h = act_fn(
            jnp.dot(x, w_pre[...], preferred_element_type=jnp.float32)
            + b_all[0:1, :])

        for i in range(n_layers):
            z = act_fn(
                jnp.dot(h.astype(cdt), w_hid[i],
                        preferred_element_type=jnp.float32)
                + b_all[i + 1:i + 2, :])
            h = z + h if res else z

        y = (jnp.dot(h.astype(cdt), w_post[...],
                     preferred_element_type=jnp.float32)
             + b_post[...])
        o_ref[...] = y.astype(o_ref.dtype)

    return kernel


def mlp_pallas(x, weight_args, dims, *, n_layers, res=True, act="gelu",
               row_tile=1024):
    """x: (..., n_input); weight_args/dims from prepare_mlp_params."""
    n_input, _n_hidden, n_output, n_in_p, n_hid_p, n_out_p = dims
    *lead, nx = x.shape
    assert nx == n_input, (nx, n_input)
    x2d = x.reshape(-1, n_input)
    n_rows = x2d.shape[0]

    gen, vmem_bytes, num_tc = _tpu_info()
    x_is = jnp.dtype(x.dtype).itemsize
    sub = max(8, 32 // x_is)                 # sublane packing of x / out tiles
    gran = 256 if gen in (6, 7) else 128     # MXU-friendly row-tile granularity

    # Row tile: as large as possible (amortizes the ~0.35us per-grid-step
    # overhead).  Only on v7x (2 TensorCores) is the tile capped to the
    # per-core share of rows; on v5e/v6e the grid is a serial loop.
    if num_tc > 1:
        cap_rows = _round_up(pl.cdiv(n_rows, num_tc), sub)
    else:
        cap_rows = _round_up(n_rows, sub)
    rt = max(min(int(row_tile), cap_rows), sub)
    rt = _round_up(rt, sub)
    if rt >= gran:
        rt = _round_up(rt, gran)

    w_bytes = sum(int(a.size) * jnp.dtype(a.dtype).itemsize for a in weight_args)

    def _vmem_need(r):
        io = 2 * r * n_in_p * x_is + 2 * r * n_out_p * x_is   # double-buffered tiles
        act_b = 6 * r * n_hid_p * 4                           # f32 activation slabs
        return w_bytes + io + act_b

    vmem_cap = int(vmem_bytes * 0.85)        # ~108 MiB v5e/v6e, ~54 MiB v7x
    if _vmem_need(sub) > vmem_cap:
        # TODO(synk): weight-streaming fallback (extra grid axis over layers)
        # for resident sets that exceed per-core VMEM.
        raise ValueError(
            f"MLP weights ({w_bytes >> 20} MiB) exceed the per-core VMEM budget "
            f"({vmem_cap >> 20} MiB); weight streaming is not implemented.")
    while rt > sub and _vmem_need(rt) > vmem_cap:
        rt = max(_round_up(rt // 2, sub), sub)

    steps = pl.cdiv(n_rows, rt)
    if num_tc > 1 and steps > 1 and steps % 2 == 1:
        # v7x megacore: prefer an even step count so both TensorCores stay busy.
        rt = max(_round_up(pl.cdiv(n_rows, steps + 1), sub), sub)
        steps = pl.cdiv(n_rows, rt)
    n_rows_p = steps * rt

    # Pad x only when needed (rows to the tile, features to 128 lanes).
    pad_rows, pad_cols = n_rows_p - n_rows, n_in_p - n_input
    if pad_rows or pad_cols:
        x2d = jnp.pad(x2d, ((0, pad_rows), (0, pad_cols)))

    x_spec = pl.BlockSpec((rt, n_in_p), lambda i: (i, 0))
    o_spec = pl.BlockSpec((rt, n_out_p), lambda i: (i, 0))
    w_specs = [_resident_spec(a.shape) for a in weight_args]

    vmem_limit = int(min(max(int(1.25 * _vmem_need(rt)), 32 * 2**20), vmem_cap))

    flops = 2 * n_rows_p * (n_in_p * n_hid_p
                            + n_layers * n_hid_p * n_hid_p
                            + n_hid_p * n_out_p)
    cost = pl.CostEstimate(
        flops=int(flops),
        transcendentals=int(n_rows_p * n_hid_p * (n_layers + 1)),
        bytes_accessed=int(x2d.size) * x_is + int(w_bytes)
        + int(n_rows_p * n_out_p) * x_is,
    )

    kernel = _make_mlp_kernel(n_layers, res, act)
    out2d = pl.pallas_call(
        kernel,
        out_shape=jax.ShapeDtypeStruct((n_rows_p, n_out_p), x.dtype),
        grid_spec=pltpu.PrefetchScalarGridSpec(
            num_scalar_prefetch=0,
            grid=(steps,),
            in_specs=[x_spec] + w_specs,
            out_specs=o_spec,
        ),
        compiler_params=pltpu.CompilerParams(
            dimension_semantics=("parallel",),
            vmem_limit_bytes=vmem_limit,
        ),
        cost_estimate=cost,
    )(x2d, *weight_args)

    if n_rows_p != n_rows or n_out_p != n_output:
        out2d = out2d[:n_rows, :n_output]
    return out2d.reshape(*lead, n_output)


def mlp_forward(x, params, *, n_layers, res=True, act="gelu", row_tile=1024,
                compute_dtype=jnp.bfloat16):
    """Convenience wrapper (re-pads weights every call). For repeated calls,
    run prepare_mlp_params once and call mlp_pallas directly (see __main__)."""
    weight_args, dims = prepare_mlp_params(params, n_layers=n_layers,
                                           compute_dtype=compute_dtype)
    return mlp_pallas(x, weight_args, dims, n_layers=n_layers, res=res, act=act,
                      row_tile=row_tile)


def init_mlp_params(key, n_input, n_hidden, n_output, n_layers):
    """Deterministic init mimicking PyTorch Linear's uniform(-1/sqrt(fan_in), ...).
    Weights stored as (fan_in, fan_out)."""
    params = {}

    def linear(key, fan_in, fan_out):
        kw, kb = jax.random.split(key)
        bound = 1.0 / jnp.sqrt(fan_in)
        w = jax.random.uniform(kw, (fan_in, fan_out), jnp.float32, -bound, bound)
        b = jax.random.uniform(kb, (1, fan_out), jnp.float32, -bound, bound)
        return w, b

    keys = jax.random.split(key, n_layers + 2)
    params["w_pre"], params["b_pre"] = linear(keys[0], n_input, n_hidden)
    for i in range(n_layers):
        params[f"w_{i}"], params[f"b_{i}"] = linear(keys[1 + i], n_hidden, n_hidden)
    params["w_post"], params["b_post"] = linear(keys[-1], n_hidden, n_output)
    return params


def mlp_reference(x, params, *, n_layers, res=True, act="gelu"):
    """Pure-JAX high-precision reference for the correctness check."""
    f = _act_fn(act)
    hp = lax.Precision.HIGHEST
    h = f(jnp.dot(x, params["w_pre"], precision=hp) + params["b_pre"])
    for i in range(n_layers):
        z = f(jnp.dot(h, params[f"w_{i}"], precision=hp) + params[f"b_{i}"])
        h = z + h if res else z
    return jnp.dot(h, params["w_post"], precision=hp) + params["b_post"]


if __name__ == "__main__":
    n_input, n_hidden, n_output, n_layers = 8, 32, 8, 2
    batch, seq = 2, 8

    key = jax.random.PRNGKey(0)
    k_x, k_p = jax.random.split(key)
    x = jax.random.normal(k_x, (batch, seq, n_input), dtype=jnp.float32)
    params = init_mlp_params(k_p, n_input, n_hidden, n_output, n_layers)

    ref = mlp_reference(x.reshape(-1, n_input), params, n_layers=n_layers, res=True)
    ref = ref.reshape(batch, seq, n_output)

    # f32 MXU operands: tight semantic check against the reference.
    wargs_f32, dims_f32 = prepare_mlp_params(params, n_layers=n_layers,
                                             compute_dtype=jnp.float32)
    run_f32 = jax.jit(functools.partial(
        mlp_pallas, dims=dims_f32, n_layers=n_layers, res=True))
    out_f32 = jax.block_until_ready(run_f32(x, wargs_f32))
    assert out_f32.shape == (batch, seq, n_output)
    assert out_f32.dtype == x.dtype
    assert jnp.allclose(out_f32, ref, atol=5e-4, rtol=5e-4), "f32 mismatch vs reference"

    # bf16 MXU operands (performance config): loose check.
    wargs_bf16, dims_bf16 = prepare_mlp_params(params, n_layers=n_layers,
                                               compute_dtype=jnp.bfloat16)
    run_bf16 = jax.jit(functools.partial(
        mlp_pallas, dims=dims_bf16, n_layers=n_layers, res=True))
    out_bf16 = jax.block_until_ready(run_bf16(x, wargs_bf16))
    assert out_bf16.shape == (batch, seq, n_output)
    assert jnp.allclose(out_bf16, ref, atol=5e-2, rtol=5e-2), "bf16 mismatch vs reference"

    print("KERNEL_OK")
</pallas_src>

<mosaic_0001>
module attributes {stable_mosaic.version = 11 : i64} {
  func.func @kernel(%arg0: i32, %arg1: memref<16x128xf32, #tpu.memory_space<vmem>>, %arg2: memref<128x128xf32, #tpu.memory_space<vmem>>, %arg3: memref<3x128xf32, #tpu.memory_space<vmem>>, %arg4: memref<2x128x128xf32, #tpu.memory_space<vmem>>, %arg5: memref<128x128xf32, #tpu.memory_space<vmem>>, %arg6: memref<1x128xf32, #tpu.memory_space<vmem>>, %arg7: memref<16x128xf32, #tpu.memory_space<vmem>>) attributes {dimension_semantics = [#tpu.dimension_semantics<parallel>], iteration_bounds = array<i64: 1>, scalar_prefetch = 0 : i64, scratch_operands = 0 : i64, tpu.core_type = #tpu.core_type<tc>, window_params = [{transform_indices = @transform_0, window_bounds = array<i64: 16, 128>}, {pipeline_mode = #tpu.pipeline_mode<synchronous>, transform_indices = @transform_1, window_bounds = array<i64: 128, 128>}, {pipeline_mode = #tpu.pipeline_mode<synchronous>, transform_indices = @transform_2, window_bounds = array<i64: 3, 128>}, {pipeline_mode = #tpu.pipeline_mode<synchronous>, transform_indices = @transform_3, window_bounds = array<i64: 2, 128, 128>}, {pipeline_mode = #tpu.pipeline_mode<synchronous>, transform_indices = @transform_4, window_bounds = array<i64: 128, 128>}, {pipeline_mode = #tpu.pipeline_mode<synchronous>, transform_indices = @transform_5, window_bounds = array<i64: 1, 128>}, {transform_indices = @transform_6, window_bounds = array<i64: 16, 128>}]} {
    %c0 = arith.constant 0 : index
    %c0_0 = arith.constant 0 : index
    %0 = vector.load %arg3[%c0, %c0_0] : memref<3x128xf32, #tpu.memory_space<vmem>>, vector<3x128xf32>
    %c0_1 = arith.constant 0 : index
    %c0_2 = arith.constant 0 : index
    %1 = vector.load %arg1[%c0_1, %c0_2] : memref<16x128xf32, #tpu.memory_space<vmem>>, vector<16x128xf32>
    %c0_3 = arith.constant 0 : index
    %c0_4 = arith.constant 0 : index
    %2 = vector.load %arg2[%c0_3, %c0_4] : memref<128x128xf32, #tpu.memory_space<vmem>>, vector<128x128xf32>
    %cst = arith.constant dense<0.000000e+00> : vector<16x128xf32>
    %3 = tpu.matmul %1, %2, %cst {dimension_numbers = #tpu.dot_dimension_numbers<[1], [0], [0], [1], [0, 0, 1, 1], [], []>} : vector<16x128xf32>, vector<128x128xf32>, vector<16x128xf32> -> vector<16x128xf32>
    %4 = vector.extract_strided_slice %0 {offsets = [0, 0], sizes = [1, 128], strides = [1, 1]} : vector<3x128xf32> to vector<1x128xf32>
    %5 = vector.broadcast %4 : vector<1x128xf32> to vector<16x128xf32>
    %6 = arith.addf %3, %5 : vector<16x128xf32>
    %cst_5 = arith.constant 5.000000e-01 : f32
    %7 = vector.broadcast %cst_5 : f32 to vector<16x128xf32>
    %8 = arith.mulf %7, %6 : vector<16x128xf32>
    %cst_6 = arith.constant 0.707106769 : f32
    %9 = vector.broadcast %cst_6 : f32 to vector<16x128xf32>
    %10 = arith.mulf %6, %9 : vector<16x128xf32>
    %11 = math.erf %10 : vector<16x128xf32>
    %cst_7 = arith.constant 1.000000e+00 : f32
    %12 = vector.broadcast %cst_7 : f32 to vector<16x128xf32>
    %13 = arith.addf %12, %11 : vector<16x128xf32>
    %14 = arith.mulf %8, %13 : vector<16x128xf32>
    %c0_8 = arith.constant 0 : index
    %c0_9 = arith.constant 0 : index
    %c0_10 = arith.constant 0 : index
    %15 = vector.load %arg4[%c0_8, %c0_9, %c0_10] : memref<2x128x128xf32, #tpu.memory_space<vmem>>, vector<1x128x128xf32>
    %16 = vector.shape_cast %15 : vector<1x128x128xf32> to vector<128x128xf32>
    %cst_11 = arith.constant dense<0.000000e+00> : vector<16x128xf32>
    %17 = tpu.matmul %14, %16, %cst_11 {dimension_numbers = #tpu.dot_dimension_numbers<[1], [0], [0], [1], [0, 0, 1, 1], [], []>} : vector<16x128xf32>, vector<128x128xf32>, vector<16x128xf32> -> vector<16x128xf32>
    %18 = vector.extract_strided_slice %0 {offsets = [1, 0], sizes = [1, 128], strides = [1, 1]} : vector<3x128xf32> to vector<1x128xf32>
    %19 = vector.broadcast %18 : vector<1x128xf32> to vector<16x128xf32>
    %20 = arith.addf %17, %19 : vector<16x128xf32>
    %cst_12 = arith.constant 5.000000e-01 : f32
    %21 = vector.broadcast %cst_12 : f32 to vector<16x128xf32>
    %22 = arith.mulf %21, %20 : vector<16x128xf32>
    %cst_13 = arith.constant 0.707106769 : f32
    %23 = vector.broadcast %cst_13 : f32 to vector<16x128xf32>
    %24 = arith.mulf %20, %23 : vector<16x128xf32>
    %25 = math.erf %24 : vector<16x128xf32>
    %cst_14 = arith.constant 1.000000e+00 : f32
    %26 = vector.broadcast %cst_14 : f32 to vector<16x128xf32>
    %27 = arith.addf %26, %25 : vector<16x128xf32>
    %28 = arith.mulf %22, %27 : vector<16x128xf32>
    %29 = arith.addf %28, %14 : vector<16x128xf32>
    %c1 = arith.constant 1 : index
    %c0_15 = arith.constant 0 : index
    %c0_16 = arith.constant 0 : index
    %30 = vector.load %arg4[%c1, %c0_15, %c0_16] : memref<2x128x128xf32, #tpu.memory_space<vmem>>, vector<1x128x128xf32>
    %31 = vector.shape_cast %30 : vector<1x128x128xf32> to vector<128x128xf32>
    %cst_17 = arith.constant dense<0.000000e+00> : vector<16x128xf32>
    %32 = tpu.matmul %29, %31, %cst_17 {dimension_numbers = #tpu.dot_dimension_numbers<[1], [0], [0], [1], [0, 0, 1, 1], [], []>} : vector<16x128xf32>, vector<128x128xf32>, vector<16x128xf32> -> vector<16x128xf32>
    %33 = vector.extract_strided_slice %0 {offsets = [2, 0], sizes = [1, 128], strides = [1, 1]} : vector<3x128xf32> to vector<1x128xf32>
    %34 = vector.broadcast %33 : vector<1x128xf32> to vector<16x128xf32>
    %35 = arith.addf %32, %34 : vector<16x128xf32>
    %cst_18 = arith.constant 5.000000e-01 : f32
    %36 = vector.broadcast %cst_18 : f32 to vector<16x128xf32>
    %37 = arith.mulf %36, %35 : vector<16x128xf32>
    %cst_19 = arith.constant 0.707106769 : f32
    %38 = vector.broadcast %cst_19 : f32 to vector<16x128xf32>
    %39 = arith.mulf %35, %38 : vector<16x128xf32>
    %40 = math.erf %39 : vector<16x128xf32>
    %cst_20 = arith.constant 1.000000e+00 : f32
    %41 = vector.broadcast %cst_20 : f32 to vector<16x128xf32>
    %42 = arith.addf %41, %40 : vector<16x128xf32>
    %43 = arith.mulf %37, %42 : vector<16x128xf32>
    %44 = arith.addf %43, %29 : vector<16x128xf32>
    %c0_21 = arith.constant 0 : index
    %c0_22 = arith.constant 0 : index
    %45 = vector.load %arg5[%c0_21, %c0_22] : memref<128x128xf32, #tpu.memory_space<vmem>>, vector<128x128xf32>
    %cst_23 = arith.constant dense<0.000000e+00> : vector<16x128xf32>
    %46 = tpu.matmul %44, %45, %cst_23 {dimension_numbers = #tpu.dot_dimension_numbers<[1], [0], [0], [1], [0, 0, 1, 1], [], []>} : vector<16x128xf32>, vector<128x128xf32>, vector<16x128xf32> -> vector<16x128xf32>
    %c0_24 = arith.constant 0 : index
    %c0_25 = arith.constant 0 : index
    %47 = vector.load %arg6[%c0_24, %c0_25] : memref<1x128xf32, #tpu.memory_space<vmem>>, vector<1x128xf32>
    %48 = vector.broadcast %47 : vector<1x128xf32> to vector<16x128xf32>
    %49 = arith.addf %46, %48 : vector<16x128xf32>
    %c0_26 = arith.constant 0 : index
    %c0_27 = arith.constant 0 : index
    %50 = vector.load %arg7[%c0_26, %c0_27] : memref<16x128xf32, #tpu.memory_space<vmem>>, vector<16x128xf32>
    tpu.vector_store %arg7[%c0_26, %c0_27], %49 {strides = array<i32>} : memref<16x128xf32, #tpu.memory_space<vmem>>, vector<16x128xf32>,
    return
  }
  func.func @transform_0(%arg0: i32) -> (i32, i32) {
    %c0_i32 = arith.constant 0 : i32
    %c0_i32_0 = arith.constant 0 : i32
    return %arg0, %c0_i32 : i32, i32
  }
  func.func @transform_1(%arg0: i32) -> (i32, i32) {
    %c0_i32 = arith.constant 0 : i32
    %c0_i32_0 = arith.constant 0 : i32
    %c0_i32_1 = arith.constant 0 : i32
    return %c0_i32, %c0_i32_0 : i32, i32
  }
  func.func @transform_2(%arg0: i32) -> (i32, i32) {
    %c0_i32 = arith.constant 0 : i32
    %c0_i32_0 = arith.constant 0 : i32
    %c0_i32_1 = arith.constant 0 : i32
    return %c0_i32, %c0_i32_0 : i32, i32
  }
  func.func @transform_3(%arg0: i32) -> (i32, i32, i32) {
    %c0_i32 = arith.constant 0 : i32
    %c0_i32_0 = arith.constant 0 : i32
    %c0_i32_1 = arith.constant 0 : i32
    %c0_i32_2 = arith.constant 0 : i32
    return %c0_i32, %c0_i32_0, %c0_i32_1 : i32, i32, i32
  }
  func.func @transform_4(%arg0: i32) -> (i32, i32) {
    %c0_i32 = arith.constant 0 : i32
    %c0_i32_0 = arith.constant 0 : i32
    %c0_i32_1 = arith.constant 0 : i32
    return %c0_i32, %c0_i32_0 : i32, i32
  }
  func.func @transform_5(%arg0: i32) -> (i32, i32) {
    %c0_i32 = arith.constant 0 : i32
    %c0_i32_0 = arith.constant 0 : i32
    %c0_i32_1 = arith.constant 0 : i32
    return %c0_i32, %c0_i32_0 : i32, i32
  }
  func.func @transform_6(%arg0: i32) -> (i32, i32) {
    %c0_i32 = arith.constant 0 : i32
    %c0_i32_0 = arith.constant 0 : i32
    return %arg0, %c0_i32 : i32, i32
  }
}

</mosaic_0001>

<bundles_post_ra>
// kernel: mlp_pallas.1
= control target key start
LH: loop header
LB: loop body
LE: loop exit
PB: predicated region body
PF: predicated region fallthrough
CT: control target
= control target key end

     0   :  { %11 = vsyncpa [#allocation3], 0  ;;  %s755_s0 = inlined_call_operand.vmem [shape: f32[16,128], index: 0, kind: input, shape index: {}]   ;;  %s756_s1 = inlined_call_operand.hbm [shape: f32[128,128], index: 1, kind: input, shape index: {}]   ;;  %s757_s2 = inlined_call_operand.vmem [shape: f32[3,128], index: 2, kind: input, shape index: {}]   ;;  %s758_s3 = inlined_call_operand.hbm [shape: f32[2,128,128], index: 3, kind: input, shape index: {}]   ;;  %s759_s4 = inlined_call_operand.hbm [shape: f32[128,128], index: 4, kind: input, shape index: {}]   ;;  %s760_s5 = inlined_call_operand.vmem [shape: f32[1,128], index: 5, kind: input, shape index: {}]   ;;  %s761_s6 = inlined_call_operand.vmem [shape: f32[16,128], index: 6, kind: output, shape index: {}]  }
   0x1   :  { %12 = vsyncpa [#allocation5], 0  ;;  %s34_s23 = sshll.u32 %s758_s3, 4  ;;  %s613_s24 = smov [#allocation4]   ;;  %s35_s23 = int_to_ptr.hbm [resolvable:$true] %s34_s23 }
   0x2   :  { %s36_s25 = sshll.u32 %s613_s24, 4  ;;  %s19_s28 = sshll.u32 %s756_s1, 4  ;;  %s37_s25 = int_to_ptr.vmem [resolvable:$true] %s36_s25  ;;  %s20_s28 = int_to_ptr.hbm [resolvable:$true] %s19_s28 }
   0x3   :  { %s614_s29 = smov 128   ;;  %s615_s30 = smov 8  }
   0x4   :  { %42 = dma.hbm_to_vmem [thread:$0]  %s35_s23, 4096, %s37_s25, [#allocation5], %s614_s29, %s614_s29, %s615_s30  }
   0x5   :  { %s616_s7 = smov [#allocation2]   ;;  %s47_s11 = sshll.u32 %s759_s4, 4  ;;  %s48_s11 = int_to_ptr.hbm [resolvable:$true] %s47_s11 }
   0x6   :  { %s21_s8 = sshll.u32 %s616_s7, 4  ;;  %s617_s3 = smov [#allocation6]   ;;  %s22_s8 = int_to_ptr.vmem [resolvable:$true] %s21_s8 }
   0x7   :  { %27 = dma.hbm_to_vmem [thread:$0]  %s20_s28, 2048, %s22_s8, [#allocation3], %s614_s29, %s614_s29, %s615_s30  }
   0x8   :  { %s49_s12 = sshll.u32 %s617_s3, 4  ;;  %s50_s12 = int_to_ptr.vmem [resolvable:$true] %s49_s12 }
   0x9   :  { %55 = dma.hbm_to_vmem [thread:$0]  %s48_s11, 2048, %s50_s12, [#allocation5], %s614_s29, %s614_s29, %s615_s30  }
   0xa   :  { %609 = dma.done.wait [#allocation3], 2048  }
   0xb   :  { %610 = vsyncadd [#allocation3], 4294965248 }
   0xc   :  { %611 = dma.done.wait [#allocation5], 6144  }
   0xd   :  { %612 = vsyncadd [#allocation5], 4294961152  ;;  %v88_v0 = vld [vmem:[#allocation2 + $0x78] sm:$0xff]  ;;  %v87_v1 = vld [vmem:[#allocation2 + $0x70] sm:$0xff] }
   0xe   :  { %90 = vmatpush.msra.mxu0 %v88_v0  ;;  %v86_v2 = vld [vmem:[#allocation2 + $0x68] sm:$0xff]  ;;  %v85_v3 = vld [vmem:[#allocation2 + $0x60] sm:$0xff]  ;;  %v84_v4 = vld [vmem:[#allocation2 + $0x58] sm:$0xff] }
   0xf   :  { %v83_v5 = vld [vmem:[#allocation2 + $0x50] sm:$0xff]  ;;  %v82_v6 = vld [vmem:[#allocation2 + $0x48] sm:$0xff]  ;;  %v81_v7 = vld [vmem:[#allocation2 + $0x40] sm:$0xff] }
  0x10   :  { %91 = vmatpush.msra.mxu0 %v87_v1  ;;  %v80_v8 = vld [vmem:[#allocation2 + $0x38] sm:$0xff]  ;;  %v79_v9 = vld [vmem:[#allocation2 + $0x30] sm:$0xff]  ;;  %v78_v10 = vld [vmem:[#allocation2 + $0x28] sm:$0xff] }
  0x11   :  { %v77_v11 = vld [vmem:[#allocation2 + $0x20] sm:$0xff]  ;;  %v76_v12 = vld [vmem:[#allocation2 + $0x18] sm:$0xff]  ;;  %v75_v13 = vld [vmem:[#allocation2 + $0x10] sm:$0xff] }
  0x12   :  { %92 = vmatpush.msra.mxu0 %v86_v2  ;;  %v74_v14 = vld [vmem:[#allocation2 + $0x8] sm:$0xff]  ;;  %v73_v15 = vld [vmem:[#allocation2] sm:$0xff]  ;;  %v216_v18 = vld [vmem:[#allocation4 + $0x78] sm:$0xff] }
  0x13   :  { %v71_v16 = vld [vmem:[%s755_s0] sm:$0xff]  ;;  %v72_v17 = vld [vmem:[%s755_s0 + $0x8] sm:$0xff]  ;;  %218 = vmatpush.msra.mxu1 %v216_v18  ;;  %v215_v19 = vld [vmem:[#allocation4 + $0x70] sm:$0xff] }
  0x14   :  { %93 = vmatpush.msra.mxu0 %v85_v3  ;;  %v671_v20 = vld [vmem:[%s757_s2] sm:$0x7]  ;;  %v214_v21 = vld [vmem:[#allocation4 + $0x68] sm:$0xff]  ;;  %v212_v24 = vld [vmem:[#allocation4 + $0x58] sm:$0xff] }
  0x15   :  { %219 = vmatpush.msra.mxu1 %v215_v19  ;;  %v213_v22 = vld [vmem:[#allocation4 + $0x60] sm:$0xff]  ;;  %v89_v23 = vperm.slane %v671_v20, 0  ;;  %v211_v26 = vld [vmem:[#allocation4 + $0x50] sm:$0xff]  ;;  %v210_v28 = vld [vmem:[#allocation4 + $0x48] sm:$0xff] }
  0x16   :  { %94 = vmatpush.msra.mxu0 %v84_v4  ;;  %v209_v30 = vld [vmem:[#allocation4 + $0x40] sm:$0xff]  ;;  %v208_v32 = vld [vmem:[#allocation4 + $0x38] sm:$0xff]  ;;  %v207_v33 = vld [vmem:[#allocation4 + $0x30] sm:$0xff] }
  0x17   :  { %220 = vmatpush.msra.mxu1 %v214_v21  ;;  %v206_v36 = vld [vmem:[#allocation4 + $0x28] sm:$0xff]  ;;  %v205_v40 = vld [vmem:[#allocation4 + $0x20] sm:$0xff]  ;;  %v204_v43 = vld [vmem:[#allocation4 + $0x18] sm:$0xff] }
  0x18   :  { %95 = vmatpush.msra.mxu0 %v83_v5  ;;  %v203_v47 = vld [vmem:[#allocation4 + $0x10] sm:$0xff]  ;;  %v202_v50 = vld [vmem:[#allocation4 + $0x8] sm:$0xff]  ;;  %v201_v55 = vld [vmem:[#allocation4] sm:$0xff] }
  0x19   :  { %221 = vmatpush.msra.mxu1 %v213_v22 }
  0x1a   :  { %96 = vmatpush.msra.mxu0 %v82_v6 }
  0x1b   :  { %222 = vmatpush.msra.mxu1 %v212_v24 }
  0x1c   :  { %97 = vmatpush.msra.mxu0 %v81_v7 }
  0x1d   :  { %223 = vmatpush.msra.mxu1 %v211_v26 }
  0x1e   :  { %98 = vmatpush.msra.mxu0 %v80_v8 }
  0x1f   :  { %224 = vmatpush.msra.mxu1 %v210_v28 }
  0x20   :  { %99 = vmatpush.msra.mxu0 %v79_v9 }
  0x21   :  { %225 = vmatpush.msra.mxu1 %v209_v30 }
  0x22   :  { %100 = vmatpush.msra.mxu0 %v78_v10 }
  0x23   :  { %226 = vmatpush.msra.mxu1 %v208_v32 }
  0x24   :  { %101 = vmatpush.msra.mxu0 %v77_v11 }
  0x25   :  { %227 = vmatpush.msra.mxu1 %v207_v33 }
  0x26   :  { %102 = vmatpush.msra.mxu0 %v76_v12 }
  0x27   :  { %228 = vmatpush.msra.mxu1 %v206_v36 }
  0x28   :  { %103 = vmatpush.msra.mxu0 %v75_v13 }
  0x29   :  { %229 = vmatpush.msra.mxu1 %v205_v40 }
  0x2a   :  { %104 = vmatpush.msra.mxu0 %v74_v14 }
  0x2b   :  { %230 = vmatpush.msra.mxu1 %v204_v43 }
  0x2c   :  { %105 = vmatpush.msra.mxu0 %v73_v15 }
  0x2d   :  { %106 = vmatmul.f32.vlgmr.msra.gmra.mxu0 %v71_v16  ;;  %231 = vmatpush.msra.mxu1 %v203_v47 }
  0x2f   :  { %232 = vmatpush.msra.mxu1 %v202_v50 }
  0x31   :  { %233 = vmatpush.msra.mxu1 %v201_v55 }
  0x35   :  { %109 = vmatmul.f32.gmra.mxu0 %v72_v17 }
  0xaa   :  { %v107_v25 = vpop.f32.mrf.mxu0 }
  0xab   :  { %v674_v27 = vadd.f32 %v107_v25, %v89_v23 }
  0xad   :  { %v677_v29 = vmul.f32 0.70710677, %v674_v27  ;;  %v113_v47 = vmul.f32 0.5, %v674_v27  ;;  %v347_v27 = vld [vmem:[#allocation4 + $0xf8] sm:$0xff] }
  0xae   :  { %349 = vmatpush.msra.mxu2 %v347_v27 }
  0xaf   :  { %v117_v31 = vmul.f32 %v677_v29, %v677_v29 }
  0xb1   :  { %v118_v34 = vmin.f32 %v117_v31, 16.0 }
  0xb2   :  { %v110_v35 = vpop.f32.mrf.mxu0 }
  0xb3   :  { %v119_v37 = vmul.f32 2.1237322e-06, %v118_v34  ;;  %v681_v38 = vadd.f32 %v110_v35, %v89_v23  ;;  %v130_v39 = vmul.f32 3.8918573e-05, %v118_v34 }
  0xb5   :  { %v120_v41 = vadd.f32 0.00028619796, %v119_v37  ;;  %v684_v42 = vmul.f32 0.70710677, %v681_v38  ;;  %v131_v44 = vadd.f32 0.001143296, %v130_v39 }
  0xb6   :  { %v114_v55 = vmul.f32 0.5, %v681_v38  ;;  %v342_v38 = vld [vmem:[#allocation4 + $0xd0] sm:$0xff] }
  0xb7   :  { %v121_v45 = vmul.f32 %v120_v41, %v118_v34  ;;  %v157_v46 = vmul.f32 %v684_v42, %v684_v42  ;;  %v132_v48 = vmul.f32 %v131_v44, %v118_v34 }
  0xb9   :  { %v158_v49 = vmin.f32 %v157_v46, 16.0  ;;  %v133_v51 = vadd.f32 0.014752088, %v132_v48  ;;  %v122_v52 = vadd.f32 0.0036580483, %v121_v45 }
  0xbb   :  { %v159_v53 = vmul.f32 2.1237322e-06, %v158_v49  ;;  %v170_v54 = vmul.f32 3.8918573e-05, %v158_v49  ;;  %v134_v56 = vmul.f32 %v133_v51, %v118_v34  ;;  %v123_v60 = vmul.f32 %v122_v52, %v118_v34 }
  0xbd   :  { %v160_v57 = vadd.f32 0.00028619796, %v159_v53  ;;  %v171_v58 = vadd.f32 0.001143296, %v170_v54  ;;  %v135_v59 = vadd.f32 0.112945676, %v134_v56 }
  0xbe   :  { %v124_v3 = vadd.f32 0.05243302, %v123_v60  ;;  %v344_v60 = vld [vmem:[#allocation4 + $0xe0] sm:$0xff] }
  0xbf   :  { %v161_v61 = vmul.f32 %v160_v57, %v158_v49  ;;  %v172_v62 = vmul.f32 %v171_v58, %v158_v49  ;;  %v136_v63 = vmul.f32 %v135_v59, %v118_v34  ;;  %v346_v58 = vld [vmem:[#allocation4 + $0xf0] sm:$0xff]  ;;  %v217_v59 = vperm.slane %v671_v20, 1 }
  0xc0   :  { %v125_v9 = vmul.f32 %v124_v3, %v118_v34  ;;  %350 = vmatpush.msra.mxu2 %v346_v58  ;;  %v340_v3 = vld [vmem:[#allocation4 + $0xc0] sm:$0xff] }
  0xc1   :  { %v173_v0 = vadd.f32 0.014752088, %v172_v62  ;;  %v162_v1 = vadd.f32 0.0036580483, %v161_v61  ;;  %v137_v2 = vadd.f32 0.4994258, %v136_v63 }
  0xc2   :  { %v126_v13 = vadd.f32 0.18741608, %v125_v9  ;;  %v343_v62 = vld [vmem:[#allocation4 + $0xd8] sm:$0xff] }
  0xc3   :  { %v174_v4 = vmul.f32 %v173_v0, %v158_v49  ;;  %v138_v5 = vmul.f32 %v137_v2, %v118_v34  ;;  %v163_v7 = vmul.f32 %v162_v1, %v158_v49  ;;  %v341_v1 = vld [vmem:[#allocation4 + $0xc8] sm:$0xff] }
  0xc4   :  { %v127_v18 = vmul.f32 %v126_v13, %v118_v34 }
  0xc5   :  { %v175_v6 = vadd.f32 0.112945676, %v174_v4  ;;  %v139_v8 = vadd.f32 1.0, %v138_v5  ;;  %v164_v12 = vadd.f32 0.05243302, %v163_v7  ;;  %v339_v4 = vld [vmem:[#allocation4 + $0xb8] sm:$0xff] }
  0xc6   :  { %v128_v24 = vadd.f32 1.1283791, %v127_v18  ;;  %v338_v7 = vld [vmem:[#allocation4 + $0xb0] sm:$0xff]  ;;  %v335_v18 = vld [vmem:[#allocation4 + $0x98] sm:$0xff] }
  0xc7   :  { %v176_v10 = vmul.f32 %v175_v6, %v158_v49  ;;  %525 = vrcp.f32 %v139_v8  ;;  %v165_v17 = vmul.f32 %v164_v12, %v158_v49  ;;  %v151_v23 = vand.u32 2147483648, %v139_v8 }
  0xc8   :  { %v149_v26 = vand.u32 2147483647, %v139_v8  ;;  %vm145_vm1 = vweird.f32 %v139_v8  ;;  %v129_v35 = vmul.f32 %v128_v24, %v677_v29 }
  0xc9   :  { %v177_v11 = vadd.f32 0.4994258, %v176_v10  ;;  %v166_v22 = vadd.f32 0.18741608, %v165_v17  ;;  %v152_v32 = vor.u32 1.1754944e-38, %v151_v23 }
  0xca   :  { %vm150_vm3 = vcmp.eq.f32.partialorder %v149_v26, 8.507059e+37 }
  0xcb   :  { %v178_v14 = vmul.f32 %v177_v11, %v158_v49  ;;  %v167_v31 = vmul.f32 %v166_v22, %v158_v49  ;;  %v337_v11 = vld [vmem:[#allocation4 + $0xa8] sm:$0xff]  ;;  %v334_v22 = vld [vmem:[#allocation4 + $0x90] sm:$0xff] }
  0xcd   :  { %v179_v15 = vadd.f32 1.0, %v178_v14  ;;  %v526_v16 = vpop.eup %525  ;;  %v168_v41 = vadd.f32 1.1283791, %v167_v31  ;;  %v336_v14 = vld [vmem:[#allocation4 + $0xa0] sm:$0xff] }
  0xce   :  { %v141_v19 = vmul.f32 %v526_v16, %v139_v8  ;;  %vm146_vm0 = vweird.f32 %v526_v16 }
  0xcf   :  { %527 = vrcp.f32 %v179_v15  ;;  %vm147_vm2 = vmor %vm145_vm1, %vm146_vm0  ;;  %v191_v40 = vand.u32 2147483648, %v179_v15  ;;  %v189_v44 = vand.u32 2147483647, %v179_v15  ;;  %vm185_vm5 = vweird.f32 %v179_v15 }
  0xd0   :  { %v142_v21 = vsub.f32 1.0, %v141_v19  ;;  %v169_v29 = vmul.f32 %v168_v41, %v684_v42  ;;  %v345_v42 = vld [vmem:[#allocation4 + $0xe8] sm:$0xff] }
  0xd1   :  { %v192_v49 = vor.u32 1.1754944e-38, %v191_v40  ;;  %vm190_vm7 = vcmp.eq.f32.partialorder %v189_v44, 8.507059e+37  ;;  %351 = vmatpush.msra.mxu2 %v345_v42 }
  0xd2   :  { %v143_v25 = vmul.f32 %v526_v16, %v142_v21 }
  0xd3   :  { %352 = vmatpush.msra.mxu2 %v344_v60 }
  0xd4   :  { %v144_v30 = vadd.f32 %v526_v16, %v143_v25 }
  0xd5   :  { %v528_v28 = vpop.eup %527  ;;  %353 = vmatpush.msra.mxu2 %v343_v62 }
  0xd6   :  { %v181_v33 = vmul.f32 %v528_v28, %v179_v15  ;;  %v148_v36 = vsel %vm147_vm2, %v526_v16, %v144_v30  ;;  %vm186_vm4 = vweird.f32 %v528_v28 }
  0xd7   :  { %v153_v34 = vsel %vm150_vm3, %v152_v32, %v148_v36  ;;  %vm187_vm6 = vmor %vm185_vm5, %vm186_vm4  ;;  %354 = vmatpush.msra.mxu2 %v342_v38 }
  0xd8   :  { %v182_v37 = vsub.f32 1.0, %v181_v33  ;;  %v154_v39 = vmul.f32 %v153_v34, %v129_v35  ;;  %v332_v33 = vld [vmem:[#allocation4 + $0x80] sm:$0xff] }
  0xd9   :  { %355 = vmatpush.msra.mxu2 %v341_v1 }
  0xda   :  { %v183_v43 = vmul.f32 %v528_v28, %v182_v37  ;;  %v513_v45 = vclamps-f32 %v154_v39, 1.0 }
  0xdb   :  { %356 = vmatpush.msra.mxu2 %v340_v3 }
  0xdc   :  { %v184_v46 = vadd.f32 %v528_v28, %v183_v43  ;;  %v197_v48 = vadd.f32 1.0, %v513_v45 }
  0xdd   :  { %357 = vmatpush.msra.mxu2 %v339_v4 }
  0xde   :  { %v188_v50 = vsel %vm187_vm6, %v528_v28, %v184_v46  ;;  %v691_v51 = vmul.f32 %v197_v48, %v113_v47  ;;  %v333_v28 = vld [vmem:[#allocation4 + $0x88] sm:$0xff] }
  0xdf   :  { %v193_v52 = vsel %vm190_vm7, %v192_v49, %v188_v50  ;;  %358 = vmatpush.msra.mxu2 %v338_v7 }
  0xe0   :  { %v194_v53 = vmul.f32 %v193_v52, %v169_v29  ;;  %234 = vmatmul.f32.vlgmr.msra.gmra.mxu1 %v691_v51 }
  0xe1   :  { %359 = vmatpush.msra.mxu2 %v337_v11 }
  0xe2   :  { %v514_v54 = vclamps-f32 %v194_v53, 1.0 }
  0xe3   :  { %360 = vmatpush.msra.mxu2 %v336_v14 }
  0xe4   :  { %v198_v56 = vadd.f32 1.0, %v514_v54 }
  0xe5   :  { %361 = vmatpush.msra.mxu2 %v335_v18 }
  0xe6   :  { %v695_v57 = vmul.f32 %v198_v56, %v114_v55 }
  0xe7   :  { %362 = vmatpush.msra.mxu2 %v334_v22 }
  0xe8   :  { %237 = vmatmul.f32.gmra.mxu1 %v695_v57 }
  0xe9   :  { %363 = vmatpush.msra.mxu2 %v333_v28 }
  0xeb   :  { %364 = vmatpush.msra.mxu2 %v332_v33 }
 0x15d   :  { %v235_v61 = vpop.f32.mrf.mxu1 }
 0x15e   :  { %v699_v63 = vadd.f32 %v235_v61, %v217_v59 }
 0x160   :  { %v702_v0 = vmul.f32 0.70710677, %v699_v63 }
 0x162   :  { %v245_v2 = vmul.f32 %v702_v0, %v702_v0 }
 0x164   :  { %v246_v5 = vmin.f32 %v245_v2, 16.0 }
 0x165   :  { %v238_v6 = vpop.f32.mrf.mxu1 }
 0x166   :  { %v247_v8 = vmul.f32 2.1237322e-06, %v246_v5  ;;  %v706_v9 = vadd.f32 %v238_v6, %v217_v59  ;;  %v258_v10 = vmul.f32 3.8918573e-05, %v246_v5 }
 0x168   :  { %v248_v12 = vadd.f32 0.00028619796, %v247_v8  ;;  %v709_v13 = vmul.f32 0.70710677, %v706_v9  ;;  %v259_v15 = vadd.f32 0.001143296, %v258_v10 }
 0x169   :  { %v242_v33 = vmul.f32 0.5, %v706_v9 }
 0x16a   :  { %v249_v16 = vmul.f32 %v248_v12, %v246_v5  ;;  %v285_v17 = vmul.f32 %v709_v13, %v709_v13  ;;  %v260_v19 = vmul.f32 %v259_v15, %v246_v5 }
 0x16c   :  { %v286_v21 = vmin.f32 %v285_v17, 16.0  ;;  %v261_v23 = vadd.f32 0.014752088, %v260_v19  ;;  %v250_v24 = vadd.f32 0.0036580483, %v249_v16 }
 0x16e   :  { %v287_v25 = vmul.f32 2.1237322e-06, %v286_v21  ;;  %v298_v26 = vmul.f32 3.8918573e-05, %v286_v21  ;;  %v262_v30 = vmul.f32 %v261_v23, %v246_v5  ;;  %v251_v36 = vmul.f32 %v250_v24, %v246_v5 }
 0x170   :  { %v288_v31 = vadd.f32 0.00028619796, %v287_v25  ;;  %v299_v32 = vadd.f32 0.001143296, %v298_v26  ;;  %v263_v35 = vadd.f32 0.112945676, %v262_v30 }
 0x171   :  { %v252_v44 = vadd.f32 0.05243302, %v251_v36 }
 0x172   :  { %v289_v34 = vmul.f32 %v288_v31, %v286_v21  ;;  %v300_v37 = vmul.f32 %v299_v32, %v286_v21  ;;  %v264_v39 = vmul.f32 %v263_v35, %v246_v5 }
 0x173   :  { %v253_v29 = vmul.f32 %v252_v44, %v246_v5  ;;  %v471_v44 = vld [vmem:[#allocation6 + $0x48] sm:$0xff] }
 0x174   :  { %v301_v40 = vadd.f32 0.014752088, %v300_v37  ;;  %v290_v41 = vadd.f32 0.0036580483, %v289_v34  ;;  %v265_v43 = vadd.f32 0.4994258, %v264_v39 }
 0x175   :  { %v254_v54 = vadd.f32 0.18741608, %v253_v29  ;;  %v476_v34 = vld [vmem:[#allocation6 + $0x70] sm:$0xff]  ;;  %v475_v37 = vld [vmem:[#allocation6 + $0x68] sm:$0xff]  ;;  %v474_v39 = vld [vmem:[#allocation6 + $0x60] sm:$0xff] }
 0x176   :  { %v302_v45 = vmul.f32 %v301_v40, %v286_v21  ;;  %v266_v46 = vmul.f32 %v265_v43, %v246_v5  ;;  %v291_v48 = vmul.f32 %v290_v41, %v286_v21  ;;  %v473_v41 = vld [vmem:[#allocation6 + $0x58] sm:$0xff]  ;;  %v472_v43 = vld [vmem:[#allocation6 + $0x50] sm:$0xff] }
 0x177   :  { %v255_v42 = vmul.f32 %v254_v54, %v246_v5 }
 0x178   :  { %v303_v47 = vadd.f32 0.112945676, %v302_v45  ;;  %v267_v49 = vadd.f32 1.0, %v266_v46  ;;  %v292_v53 = vadd.f32 0.05243302, %v291_v48  ;;  %v470_v46 = vld [vmem:[#allocation6 + $0x40] sm:$0xff] }
 0x179   :  { %v256_v38 = vadd.f32 1.1283791, %v255_v42 }
 0x17a   :  { %v304_v50 = vmul.f32 %v303_v47, %v286_v21  ;;  %529 = vrcp.f32 %v267_v49  ;;  %v293_v58 = vmul.f32 %v292_v53, %v286_v21  ;;  %v279_v62 = vand.u32 2147483648, %v267_v49  ;;  %v467_v53 = vld [vmem:[#allocation6 + $0x28] sm:$0xff] }
 0x17b   :  { %v277_v2 = vand.u32 2147483647, %v267_v49  ;;  %vm273_vm9 = vweird.f32 %v267_v49  ;;  %v257_v10 = vmul.f32 %v256_v38, %v702_v0 }
 0x17c   :  { %v305_v52 = vadd.f32 0.4994258, %v304_v50  ;;  %v294_v61 = vadd.f32 0.18741608, %v293_v58  ;;  %v280_v7 = vor.u32 1.1754944e-38, %v279_v62  ;;  %v464_v62 = vld [vmem:[#allocation6 + $0x10] sm:$0xff] }
 0x17d   :  { %vm278_vm11 = vcmp.eq.f32.partialorder %v277_v2, 8.507059e+37 }
 0x17e   :  { %v306_v55 = vmul.f32 %v305_v52, %v286_v21  ;;  %v295_v6 = vmul.f32 %v294_v61, %v286_v21  ;;  %v241_v21 = vmul.f32 0.5, %v699_v63 }
 0x180   :  { %v307_v56 = vadd.f32 1.0, %v306_v55  ;;  %v530_v27 = vpop.eup %529  ;;  %v296_v16 = vadd.f32 1.1283791, %v295_v6 }
 0x181   :  { %v269_v59 = vmul.f32 %v530_v27, %v267_v49  ;;  %vm274_vm8 = vweird.f32 %v530_v27  ;;  %v468_v49 = vld [vmem:[#allocation6 + $0x30] sm:$0xff] }
 0x182   :  { %531 = vrcp.f32 %v307_v56  ;;  %vm275_vm10 = vmor %vm273_vm9, %vm274_vm8  ;;  %v319_v15 = vand.u32 2147483648, %v307_v56  ;;  %v317_v18 = vand.u32 2147483647, %v307_v56  ;;  %vm313_vm13 = vweird.f32 %v307_v56 }
 0x183   :  { %v270_v60 = vsub.f32 1.0, %v269_v59  ;;  %v297_v0 = vmul.f32 %v296_v16, %v709_v13  ;;  %v477_v13 = vld [vmem:[#allocation6 + $0x78] sm:$0xff] }
 0x184   :  { %v320_v24 = vor.u32 1.1754944e-38, %v319_v15  ;;  %vm318_vm15 = vcmp.eq.f32.partialorder %v317_v18, 8.507059e+37  ;;  %482 = vmatpush.msra.mxu3 %v477_v13  ;;  %v465_v59 = vld [vmem:[#allocation6 + $0x18] sm:$0xff] }
 0x185   :  { %v271_v1 = vmul.f32 %v530_v27, %v270_v60 }
 0x186   :  { %483 = vmatpush.msra.mxu3 %v476_v34 }
 0x187   :  { %v272_v4 = vadd.f32 %v530_v27, %v271_v1 }
 0x188   :  { %v532_v3 = vpop.eup %531  ;;  %484 = vmatpush.msra.mxu3 %v475_v37 }
 0x189   :  { %v309_v8 = vmul.f32 %v532_v3, %v307_v56  ;;  %v276_v11 = vsel %vm275_vm10, %v530_v27, %v272_v4  ;;  %vm314_vm12 = vweird.f32 %v532_v3  ;;  %v466_v56 = vld [vmem:[#allocation6 + $0x20] sm:$0xff]  ;;  %v463_v4 = vld [vmem:[#allocation6 + $0x8] sm:$0xff] }
 0x18a   :  { %v281_v5 = vsel %vm278_vm11, %v280_v7, %v276_v11  ;;  %vm315_vm14 = vmor %vm313_vm13, %vm314_vm12  ;;  %485 = vmatpush.msra.mxu3 %v474_v39 }
 0x18b   :  { %v310_v12 = vsub.f32 1.0, %v309_v8  ;;  %v282_v14 = vmul.f32 %v281_v5, %v257_v10  ;;  %v462_v10 = vld [vmem:[#allocation6] sm:$0xff] }
 0x18c   :  { %486 = vmatpush.msra.mxu3 %v473_v41 }
 0x18d   :  { %v311_v17 = vmul.f32 %v532_v3, %v310_v12  ;;  %v515_v19 = vclamps-f32 %v282_v14, 1.0 }
 0x18e   :  { %487 = vmatpush.msra.mxu3 %v472_v43 }
 0x18f   :  { %v312_v22 = vadd.f32 %v532_v3, %v311_v17  ;;  %v325_v23 = vadd.f32 1.0, %v515_v19 }
 0x190   :  { %488 = vmatpush.msra.mxu3 %v471_v44 }
 0x191   :  { %v316_v25 = vsel %vm315_vm14, %v532_v3, %v312_v22  ;;  %v327_v26 = vmul.f32 %v325_v23, %v241_v21 }
 0x192   :  { %v321_v28 = vsel %vm318_vm15, %v320_v24, %v316_v25  ;;  %489 = vmatpush.msra.mxu3 %v470_v46 }
 0x193   :  { %v322_v30 = vmul.f32 %v321_v28, %v297_v0  ;;  %v717_v31 = vadd.f32 %v327_v26, %v691_v51  ;;  %v348_v51 = vperm.slane %v671_v20, 2  ;;  %v469_v20 = vld [vmem:[#allocation6 + $0x38] sm:$0xff] }
 0x194   :  { %490 = vmatpush.msra.mxu3 %v469_v20 }
 0x195   :  { %v516_v32 = vclamps-f32 %v322_v30, 1.0  ;;  %365 = vmatmul.f32.vlgmr.msra.gmra.mxu2 %v717_v31 }
 0x196   :  { %491 = vmatpush.msra.mxu3 %v468_v49 }
 0x197   :  { %v326_v35 = vadd.f32 1.0, %v516_v32 }
 0x198   :  { %492 = vmatpush.msra.mxu3 %v467_v53 }
 0x199   :  { %v328_v63 = vmul.f32 %v326_v35, %v242_v33 }
 0x19a   :  { %493 = vmatpush.msra.mxu3 %v466_v56 }
 0x19b   :  { %v722_v36 = vadd.f32 %v328_v63, %v695_v57 }
 0x19c   :  { %494 = vmatpush.msra.mxu3 %v465_v59 }
 0x19d   :  { %368 = vmatmul.f32.gmra.mxu2 %v722_v36 }
 0x19e   :  { %495 = vmatpush.msra.mxu3 %v464_v62 }
 0x1a0   :  { %496 = vmatpush.msra.mxu3 %v463_v4 }
 0x1a2   :  { %497 = vmatpush.msra.mxu3 %v462_v10 }
 0x218   :  { %v366_v40 = vpop.f32.mrf.mxu2 }
 0x219   :  { %v726_v9 = vadd.f32 %v366_v40, %v348_v51 }
 0x21b   :  { %v729_v57 = vmul.f32 0.70710677, %v726_v9 }
 0x21d   :  { %v376_v45 = vmul.f32 %v729_v57, %v729_v57 }
 0x21f   :  { %v377_v47 = vmin.f32 %v376_v45, 16.0 }
 0x220   :  { %v369_v48 = vpop.f32.mrf.mxu2 }
 0x221   :  { %v378_v29 = vmul.f32 2.1237322e-06, %v377_v47  ;;  %v733_v50 = vadd.f32 %v369_v48, %v348_v51  ;;  %v389_v52 = vmul.f32 3.8918573e-05, %v377_v47 }
 0x223   :  { %v379_v54 = vadd.f32 0.00028619796, %v378_v29  ;;  %v736_v55 = vmul.f32 0.70710677, %v733_v50  ;;  %v390_v27 = vadd.f32 0.001143296, %v389_v52 }
 0x225   :  { %v380_v58 = vmul.f32 %v379_v54, %v377_v47  ;;  %v416_v42 = vmul.f32 %v736_v55, %v736_v55  ;;  %v391_v60 = vmul.f32 %v390_v27, %v377_v47 }
 0x227   :  { %v417_v61 = vmin.f32 %v416_v42, 16.0  ;;  %v392_v38 = vadd.f32 0.014752088, %v391_v60  ;;  %v381_v1 = vadd.f32 0.0036580483, %v380_v58 }
 0x229   :  { %v418_v2 = vmul.f32 2.1237322e-06, %v417_v61  ;;  %v429_v3 = vmul.f32 3.8918573e-05, %v417_v61  ;;  %v393_v6 = vmul.f32 %v392_v38, %v377_v47  ;;  %v382_v5 = vmul.f32 %v381_v1, %v377_v47 }
 0x22b   :  { %v419_v7 = vadd.f32 0.00028619796, %v418_v2  ;;  %v430_v8 = vadd.f32 0.001143296, %v429_v3  ;;  %v394_v11 = vadd.f32 0.112945676, %v393_v6 }
 0x22c   :  { %v383_v19 = vadd.f32 0.05243302, %v382_v5 }
 0x22d   :  { %v420_v12 = vmul.f32 %v419_v7, %v417_v61  ;;  %v431_v14 = vmul.f32 %v430_v8, %v417_v61  ;;  %v395_v15 = vmul.f32 %v394_v11, %v377_v47  ;;  %v373_v8 = vmul.f32 0.5, %v733_v50 }
 0x22e   :  { %v384_v25 = vmul.f32 %v383_v19, %v377_v47 }
 0x22f   :  { %v432_v16 = vadd.f32 0.014752088, %v431_v14  ;;  %v421_v17 = vadd.f32 0.0036580483, %v420_v12  ;;  %v396_v18 = vadd.f32 0.4994258, %v395_v15 }
 0x230   :  { %v385_v32 = vadd.f32 0.18741608, %v384_v25 }
 0x231   :  { %v433_v22 = vmul.f32 %v432_v16, %v417_v61  ;;  %v397_v21 = vmul.f32 %v396_v18, %v377_v47  ;;  %v422_v24 = vmul.f32 %v421_v17, %v417_v61 }
 0x232   :  { %v386_v34 = vmul.f32 %v385_v32, %v377_v47 }
 0x233   :  { %v434_v23 = vadd.f32 0.112945676, %v433_v22  ;;  %v398_v0 = vadd.f32 1.0, %v397_v21  ;;  %v423_v30 = vadd.f32 0.05243302, %v422_v24 }
 0x234   :  { %v387_v41 = vadd.f32 1.1283791, %v386_v34 }
 0x235   :  { %v435_v26 = vmul.f32 %v434_v23, %v417_v61  ;;  %533 = vrcp.f32 %v398_v0  ;;  %v424_v13 = vmul.f32 %v423_v30, %v417_v61  ;;  %v410_v40 = vand.u32 2147483648, %v398_v0 }
 0x236   :  { %v408_v44 = vand.u32 2147483647, %v398_v0  ;;  %vm404_vm1 = vweird.f32 %v398_v0  ;;  %v388_v29 = vmul.f32 %v387_v41, %v729_v57 }
 0x237   :  { %v436_v28 = vadd.f32 0.4994258, %v435_v26  ;;  %v425_v39 = vadd.f32 0.18741608, %v424_v13  ;;  %v411_v48 = vor.u32 1.1754944e-38, %v410_v40 }
 0x238   :  { %vm409_vm3 = vcmp.eq.f32.partialorder %v408_v44, 8.507059e+37 }
 0x239   :  { %v437_v33 = vmul.f32 %v436_v28, %v417_v61  ;;  %v426_v20 = vmul.f32 %v425_v39, %v417_v61  ;;  %v372_v61 = vmul.f32 0.5, %v726_v9 }
 0x23b   :  { %v438_v35 = vadd.f32 1.0, %v437_v33  ;;  %v534_v63 = vpop.eup %533  ;;  %v427_v27 = vadd.f32 1.1283791, %v426_v20 }
 0x23c   :  { %v400_v37 = vmul.f32 %v534_v63, %v398_v0  ;;  %vm405_vm0 = vweird.f32 %v534_v63 }
 0x23d   :  { %535 = vrcp.f32 %v438_v35  ;;  %vm406_vm2 = vmor %vm404_vm1, %vm405_vm0  ;;  %v450_v56 = vand.u32 2147483648, %v438_v35  ;;  %v448_v42 = vand.u32 2147483647, %v438_v35  ;;  %vm444_vm5 = vweird.f32 %v438_v35 }
 0x23e   :  { %v401_v51 = vsub.f32 1.0, %v400_v37  ;;  %v428_v57 = vmul.f32 %v427_v27, %v736_v55  ;;  %v524_v55 = vld [vmem:[%s760_s5] ss:$0 sm:$0xff] }
 0x23f   :  { %v451_v38 = vor.u32 1.1754944e-38, %v450_v56  ;;  %vm449_vm7 = vcmp.eq.f32.partialorder %v448_v42, 8.507059e+37 }
 0x240   :  { %v402_v43 = vmul.f32 %v534_v63, %v401_v51 }
 0x242   :  { %v403_v46 = vadd.f32 %v534_v63, %v402_v43 }
 0x243   :  { %v536_v45 = vpop.eup %535 }
 0x244   :  { %v440_v49 = vmul.f32 %v536_v45, %v438_v35  ;;  %v407_v52 = vsel %vm406_vm2, %v534_v63, %v403_v46  ;;  %vm445_vm4 = vweird.f32 %v536_v45 }
 0x245   :  { %v412_v47 = vsel %vm409_vm3, %v411_v48, %v407_v52  ;;  %vm446_vm6 = vmor %vm444_vm5, %vm445_vm4 }
 0x246   :  { %v441_v53 = vsub.f32 1.0, %v440_v49  ;;  %v413_v54 = vmul.f32 %v412_v47, %v388_v29 }
 0x248   :  { %v442_v58 = vmul.f32 %v536_v45, %v441_v53  ;;  %v517_v59 = vclamps-f32 %v413_v54, 1.0 }
 0x24a   :  { %v443_v60 = vadd.f32 %v536_v45, %v442_v58  ;;  %v456_v62 = vadd.f32 1.0, %v517_v59 }
 0x24c   :  { %v447_v1 = vsel %vm446_vm6, %v536_v45, %v443_v60  ;;  %v458_v2 = vmul.f32 %v456_v62, %v372_v61 }
 0x24d   :  { %v452_v3 = vsel %vm449_vm7, %v451_v38, %v447_v1 }
 0x24e   :  { %v453_v4 = vmul.f32 %v452_v3, %v428_v57  ;;  %v460_v6 = vadd.f32 %v458_v2, %v717_v31 }
 0x250   :  { %v518_v7 = vclamps-f32 %v453_v4, 1.0  ;;  %498 = vmatmul.f32.vlgmr.msra.gmra.mxu3 %v460_v6 }
 0x252   :  { %v457_v10 = vadd.f32 1.0, %v518_v7 }
 0x254   :  { %v459_v11 = vmul.f32 %v457_v10, %v373_v8 }
 0x256   :  { %v461_v9 = vadd.f32 %v459_v11, %v722_v36 }
 0x258   :  { %501 = vmatmul.f32.gmra.mxu3 %v461_v9 }
 0x2d3   :  { %v499_v5 = vpop.f32.mrf.mxu3 }
 0x2d4   :  { %v500_v12 = vadd.f32 %v524_v55, %v499_v5 }
 0x2d6   :  { %505 = vst [vmem:[%s761_s6] sm:$0xff] %v500_v12 }
 0x2db   :  { %v502_v31 = vpop.f32.mrf.mxu3 }
 0x2dc   :  { %v503_v14 = vadd.f32 %v524_v55, %v502_v31 }
 0x2de   :  { %506 = vst [vmem:[%s761_s6 + $0x8] sm:$0xff] %v503_v14 }
 0x2df   :  { %511 = vsyncpa [#allocation3], 1 }
 0x2e0   :  { %512 = vsyncpa [#allocation5], 1 }

</bundles_post_ra>
